<compile_context>
chip_gen: v7x
topology: tpu7x:2x2x1
jax: 0.10.0
libtpu: 0.0.40
codegen_flags: <defaults>
</compile_context>

<pallas_src>
import functools

import jax
import jax.numpy as jnp
from jax import lax
from jax.experimental import pallas as pl
from jax.experimental.pallas import tpu as pltpu

EPS = 1e-5  # nn.BatchNorm2d default


# --------------------- pass 1: sub-pixel matmul + per-channel stats -----------------------
def _matmul_stats_kernel(p_ref, w_ref, y_ref, ssum_ref, ssq_ref):
    # p_ref: (CK, tm) bf16 patch tile        w_ref: (S2*Cout, CK) bf16, resident
    # y_ref: (S2*Cout, tm) bf16 output tile
    # ssum/ssq_ref: (S2*Cout, 1) f32 per-batch partial accumulators; resident along the
    #   "arbitrary" m axis, private per batch-grid-point so the batch axis can be "parallel".
    @pl.when(pl.program_id(1) == 0)
    def _():
        ssum_ref[...] = jnp.zeros_like(ssum_ref)
        ssq_ref[...] = jnp.zeros_like(ssq_ref)

    y = jnp.dot(w_ref[...], p_ref[...], preferred_element_type=jnp.float32)  # (S2C, tm) f32
    y_ref[...] = y.astype(y_ref.dtype)
    ssum_ref[...] += jnp.sum(y, axis=-1, keepdims=True)
    ssq_ref[...] += jnp.sum(y * y, axis=-1, keepdims=True)
    # TODO(synk): lane-blocked (S2C,128) stats scratch + single final XLU reduce; low priority
    # while this pass is HBM-bound.


# ---------------------- pass 2: folded BN (scale/shift) + ReLU, in place ------------------
def _bn_relu_kernel(y_ref, scale_ref, shift_ref, o_ref):
    # y_ref/o_ref: (S2*Cout, tm2) bf16 (aliased buffers); scale/shift: (S2*Cout, 1) f32
    v = y_ref[...].astype(jnp.float32)
    o_ref[...] = jnp.maximum(v * scale_ref[...] + shift_ref[...], 0.0).astype(o_ref.dtype)


# ------------------------------------ helpers ---------------------------------------------
def _phase_taps(stride, padding, K):
    """Sub-pixel taps: out[., S*ib + q, .] += x[., ib + t, .] * W_t[., q + padding - S*t, .]."""
    taps = []
    for q in range(stride):
        tq = []
        for t in range(-(K + 1), K + 2):
            k = q + padding - stride * t
            if 0 <= k < K:
                tq.append((t, k))
        taps.append(tq)
    return taps


def _round_up(v, m):
    return -(-v // m) * m


def _vmem_limit_bytes():
    # Generation-aware budget: 128 MiB (v5e/v6e) -> 96 MB limit; 64 MiB (v7x) -> 48 MB.
    try:
        cap = int(pltpu.get_tpu_info().vmem_capacity_bytes)
    except Exception:
        cap = 64 * 1024 * 1024  # conservative fallback (v7x per-core VMEM)
    return min(cap * 3 // 4, 96 * 1024 * 1024)


def _pick_tiles(M, CK, S2C, vmem_limit):
    budget = int(vmem_limit * 0.8)          # headroom for compiler scratch / semaphores
    Mp = _round_up(M, 128)                  # lane-dense spatial extent (zero-padded)

    def p1_bytes(t):  # 2x-buffered bf16 patch & y blocks, resident bf16 weights, f32 temps
        return (2 * CK * t + 2 * S2C * t + 2 * S2C * CK) * 2 + 2 * S2C * t * 4 + (1 << 20)

    tm = 128
    for cand in (4096, 2048, 1024, 512, 256, 128):
        if Mp % cand == 0 and p1_bytes(cand) <= budget:
            tm = cand
            break

    def p2_bytes(t):  # 2x-buffered bf16 in + aliased out blocks, f32 temp
        return 4 * S2C * t * 2 + 2 * S2C * t * 4 + (1 << 20)

    tm2 = 128  # pass 2 is pure streaming: decouple and take the biggest tile that fits
    for cand in sorted({Mp, 16384, 8192, 4096, 2048, 1024, 512, 256, 128}, reverse=True):
        if Mp % cand == 0 and p2_bytes(cand) <= budget:
            tm2 = cand
            break
    return tm, Mp, tm2


# ------------------------------------ forward ---------------------------------------------
def decbdr2d_forward(x, weight_t, bias, gamma, beta, *, stride, padding, output_padding):
    """DECBDR2d forward: ConvTranspose2d -> BatchNorm2d (batch stats) -> ReLU.

    x:        (N, Cin, H, W)
    weight_t: (Cin, Cout, K, K)   PyTorch ConvTranspose2d weight layout
    bias:     (Cout,)  accepted for interface parity only -- a per-channel constant is exactly
                       cancelled by batch-stats BatchNorm, so it is unused (training mode only).
    gamma, beta: (Cout,)
    """
    del bias
    N, Cin, H, W = x.shape
    _, Cout, K, _ = weight_t.shape
    S = int(stride)
    S2 = S * S

    Ho = (H - 1) * S - 2 * padding + K + output_padding
    Wo = (W - 1) * S - 2 * padding + K + output_padding
    # TODO(synk): mask out-of-range phase rows/cols so configs with Ho % stride != 0 keep exact
    # BN statistics; every CycleGAN decoder config satisfies this divisibility.
    assert Ho % S == 0 and Wo % S == 0, "phase decomposition requires stride | (Ho, Wo)"
    Hp, Wp = Ho // S, Wo // S

    # ---- sub-pixel decomposition of the transposed conv ------------------------------------
    # out[n, o, S*yb+py, S*xb+px] = sum_{c,tr,tc} x[n,c,yb+tr,xb+tc]
    #                                 * W_t[c, o, py+padding-S*tr, px+padding-S*tc]
    taps = _phase_taps(S, padding, K)
    t_vals = sorted({t for tq in taps for (t, _) in tq})
    t_lo, t_hi = t_vals[0], t_vals[-1]
    KP = t_hi - t_lo + 1                    # low-res window extent per spatial dim
    CK = Cin * KP * KP                      # contracted dim (no structural-zero columns)
    S2C = S2 * Cout                         # fused (phase, channel) output rows

    # patches: (N, Cin*KP*KP, Hp*Wp) in bf16 -- cast *before* building the windows.
    xb = x.astype(jnp.bfloat16)
    pad_lo = max(0, -t_lo)
    pad_hi_h = max(0, (Hp - 1) + t_hi - (H - 1))
    pad_hi_w = max(0, (Wp - 1) + t_hi - (W - 1))
    xp = jnp.pad(xb, ((0, 0), (0, 0), (pad_lo, pad_hi_h), (pad_lo, pad_hi_w)))
    off = t_lo + pad_lo
    cols = jnp.stack([xp[:, :, off + i: off + i + Hp, off + j: off + j + Wp]
                      for i in range(KP) for j in range(KP)], axis=2)
    patches = cols.reshape(N, CK, Hp * Wp)
    # TODO(synk): build these windows in-kernel (BlockSpec over low-res row chunks) to also
    # drop the KP^2 wrapper-side read amplification.

    # scattered weight matrix: rows ordered (py, px, o), cols ordered (c, tr, tc).
    wt_oc = jnp.transpose(weight_t.astype(jnp.float32), (1, 0, 2, 3))  # (Cout, Cin, K, K)
    w6 = jnp.zeros((S, S, Cout, Cin, KP, KP), jnp.float32)
    for py in range(S):
        for (tr, kh) in taps[py]:
            for px in range(S):
                for (tc, kw) in taps[px]:
                    w6 = w6.at[py, px, :, :, tr - t_lo, tc - t_lo].set(wt_oc[:, :, kh, kw])
    w_mat = w6.reshape(S2C, CK).astype(jnp.bfloat16)

    M = Hp * Wp
    vmem_limit = _vmem_limit_bytes()
    tm, Mp, tm2 = _pick_tiles(M, CK, S2C, vmem_limit)
    if Mp != M:
        # zero columns -> zero y rows -> no effect on the BN sums (count uses the true N*Ho*Wo)
        patches = jnp.pad(patches, ((0, 0), (0, 0), (0, Mp - M)))

    # ---------------------------------------- pass 1 ----------------------------------------
    cost1 = pl.CostEstimate(
        flops=2 * N * Mp * CK * S2C + 4 * N * Mp * S2C,
        transcendentals=0,
        bytes_accessed=N * CK * Mp * 2 + S2C * CK * 2 + N * S2C * Mp * 2 + 2 * N * S2C * 4,
    )
    y_flat, ssum, ssq = pl.pallas_call(
        _matmul_stats_kernel,
        grid=(N, Mp // tm),
        in_specs=[
            pl.BlockSpec((None, CK, tm), lambda b, m: (b, 0, m)),    # patch tiles (bf16)
            pl.BlockSpec((S2C, CK), lambda b, m: (0, 0)),            # scattered weights
        ],
        out_specs=(
            pl.BlockSpec((None, S2C, tm), lambda b, m: (b, 0, m)),   # y tiles (bf16)
            pl.BlockSpec((None, S2C, 1), lambda b, m: (b, 0, 0)),    # per-batch sum partials
            pl.BlockSpec((None, S2C, 1), lambda b, m: (b, 0, 0)),    # per-batch sumsq partials
        ),
        out_shape=(
            jax.ShapeDtypeStruct((N, S2C, Mp), jnp.bfloat16),
            jax.ShapeDtypeStruct((N, S2C, 1), jnp.float32),
            jax.ShapeDtypeStruct((N, S2C, 1), jnp.float32),
        ),
        compiler_params=pltpu.CompilerParams(
            # batch axis is now safe to shard across v7x's 2 TensorCores (per-batch partials);
            # the m axis accumulates into the resident stats block -> "arbitrary".
            dimension_semantics=("parallel", "arbitrary"),
            vmem_limit_bytes=vmem_limit,
        ),
        cost_estimate=cost1,
    )(patches, w_mat)

    # ---------- fold BN into one per-channel scale/shift (tiny, plain JAX) ------------------
    cnt = float(N * Ho * Wo)
    ssum_c = jnp.sum(ssum[:, :, 0], axis=0).reshape(S2, Cout).sum(axis=0)   # (Cout,)
    ssq_c = jnp.sum(ssq[:, :, 0], axis=0).reshape(S2, Cout).sum(axis=0)
    mean = ssum_c / cnt
    # E[y^2]-E[y]^2 in f32; clamp guards tiny negative values from cancellation.
    # TODO(synk): switch to shifted/Welford accumulation if per-channel |mean| >> std.
    var = jnp.maximum(ssq_c / cnt - mean * mean, 0.0)
    scale = gamma.astype(jnp.float32) * lax.rsqrt(var + EPS)
    shift = beta.astype(jnp.float32) - mean * scale
    scale_rows = jnp.tile(scale, S2).reshape(S2C, 1)   # rows are (phase, o) ordered
    shift_rows = jnp.tile(shift, S2).reshape(S2C, 1)

    # ---------------------------------------- pass 2 ----------------------------------------
    cost2 = pl.CostEstimate(
        flops=3 * N * Mp * S2C,
        transcendentals=0,
        bytes_accessed=2 * N * S2C * Mp * 2 + 2 * S2C * 4,
    )
    out_flat = pl.pallas_call(
        _bn_relu_kernel,
        grid=(N, Mp // tm2),
        in_specs=[
            pl.BlockSpec((None, S2C, tm2), lambda b, m: (b, 0, m)),
            pl.BlockSpec((S2C, 1), lambda b, m: (0, 0)),
            pl.BlockSpec((S2C, 1), lambda b, m: (0, 0)),
        ],
        out_specs=pl.BlockSpec((None, S2C, tm2), lambda b, m: (b, 0, m)),
        out_shape=jax.ShapeDtypeStruct((N, S2C, Mp), jnp.bfloat16),
        input_output_aliases={0: 0},   # in-place on the pass-1 y buffer: no 2nd big HBM alloc
        compiler_params=pltpu.CompilerParams(
            dimension_semantics=("parallel", "parallel"),
            vmem_limit_bytes=vmem_limit,
        ),
        cost_estimate=cost2,
    )(y_flat, scale_rows, shift_rows)

    # ---------------- depth-to-space: (phase, o, low-res) -> NCHW, cast to f32 --------------
    # TODO(synk): fold this interleave into pass 2 via lane-strided stores to save one extra
    # output-sized HBM pass (left to a fused XLA transpose+convert for lowering robustness).
    z = out_flat[:, :, :M] if Mp != M else out_flat
    z = z.reshape(N, S, S, Cout, Hp, Wp)              # (n, py, px, o, yb, xb)
    z = jnp.transpose(z, (0, 3, 4, 1, 5, 2))          # (n, o, yb, py, xb, px)
    return z.reshape(N, Cout, Ho, Wo).astype(jnp.float32)


if __name__ == "__main__":
    # small, deterministic config (see NOTE above for why stride=2)
    N, Cin, H, W = 2, 4, 16, 16
    Cout, K = 8, 3
    stride, padding, output_padding = 2, 1, 1

    key = jax.random.PRNGKey(0)
    kx, kw, kb = jax.random.split(key, 3)

    x = jax.random.normal(kx, (N, Cin, H, W), dtype=jnp.float32)

    # deterministic parameter init (shapes match nn.ConvTranspose2d / nn.BatchNorm2d)
    fan_in = Cin * K * K
    bound = 1.0 / (fan_in ** 0.5)
    weight_t = jax.random.uniform(kw, (Cin, Cout, K, K), minval=-bound, maxval=bound,
                                  dtype=jnp.float32)
    bias = jax.random.uniform(kb, (Cout,), minval=-bound, maxval=bound, dtype=jnp.float32)
    gamma = jnp.ones((Cout,), jnp.float32)      # BatchNorm default weight
    beta = jnp.zeros((Cout,), jnp.float32)      # BatchNorm default bias

    fwd = jax.jit(functools.partial(decbdr2d_forward, stride=stride, padding=padding,
                                    output_padding=output_padding))
    out = jax.block_until_ready(fwd(x, weight_t, bias, gamma, beta))

    # pure-JAX f32 reference: ConvTranspose2d (+bias) -> BatchNorm2d (batch stats) -> ReLU
    w_conv_ref = jnp.transpose(weight_t, (1, 0, 2, 3))[:, :, ::-1, ::-1]   # (Cout, Cin, K, K)
    pad = K - 1 - padding
    y_ref = lax.conv_general_dilated(
        x, w_conv_ref, window_strides=(1, 1),
        padding=((pad, pad + output_padding), (pad, pad + output_padding)),
        lhs_dilation=(stride, stride), rhs_dilation=(1, 1),
        dimension_numbers=("NCHW", "OIHW", "NCHW"))
    y_ref = y_ref + bias.reshape(1, Cout, 1, 1)
    mean_r = jnp.mean(y_ref, axis=(0, 2, 3), keepdims=True)
    var_r = jnp.mean((y_ref - mean_r) ** 2, axis=(0, 2, 3), keepdims=True)
    ref = jnp.maximum((y_ref - mean_r) * lax.rsqrt(var_r + EPS)
                      * gamma.reshape(1, Cout, 1, 1) + beta.reshape(1, Cout, 1, 1), 0.0)

    assert out.shape == (N, Cout, 2 * H, 2 * W), out.shape
    assert bool(jnp.isfinite(out).all()) and bool(jnp.all(out >= 0.0))
    # bf16 matmul operands + bf16 y intermediate => allow ~bf16-level tolerance
    assert bool(jnp.allclose(out, ref, atol=4e-2, rtol=4e-2)), \
        float(jnp.max(jnp.abs(out - ref)))
    print("KERNEL_OK")
</pallas_src>

<mosaic_0001>
module attributes {stable_mosaic.version = 11 : i64} {
  func.func @_matmul_stats_kernel(%arg0: i32, %arg1: i32, %arg2: memref<1x16x256xbf16, #tpu.memory_space<vmem>>, %arg3: memref<32x16xbf16, #tpu.memory_space<vmem>>, %arg4: memref<1x32x256xbf16, #tpu.memory_space<vmem>>, %arg5: memref<1x32x1xf32, #tpu.memory_space<vmem>>, %arg6: memref<1x32x1xf32, #tpu.memory_space<vmem>>) attributes {dimension_semantics = [#tpu.dimension_semantics<parallel>, #tpu.dimension_semantics<arbitrary>], iteration_bounds = array<i64: 2, 1>, scalar_prefetch = 0 : i64, scratch_operands = 0 : i64, tpu.core_type = #tpu.core_type<tc>, window_params = [{transform_indices = @transform_0, window_bounds = array<i64: 1, 16, 256>}, {pipeline_mode = #tpu.pipeline_mode<synchronous>, transform_indices = @transform_1, window_bounds = array<i64: 32, 16>}, {transform_indices = @transform_2, window_bounds = array<i64: 1, 32, 256>}, {transform_indices = @transform_3, window_bounds = array<i64: 1, 32, 1>}, {transform_indices = @transform_4, window_bounds = array<i64: 1, 32, 1>}]} {
    %c0_i32 = arith.constant 0 : i32
    %0 = arith.cmpi eq, %arg1, %c0_i32 : i32
    %1 = arith.extui %0 : i1 to i32
    %c0_i32_0 = arith.constant 0 : i32
    %2 = arith.cmpi ne, %1, %c0_i32_0 : i32
    scf.if %2 {
      %cst_22 = arith.constant 0.000000e+00 : f32
      %28 = vector.broadcast %cst_22 : f32 to vector<32x1xf32>
      %c0_23 = arith.constant 0 : index
      %c0_24 = arith.constant 0 : index
      %c0_25 = arith.constant 0 : index
      %29 = vector.load %arg5[%c0_23, %c0_24, %c0_25] : memref<1x32x1xf32, #tpu.memory_space<vmem>>, vector<1x32x1xf32>
      %30 = vector.shape_cast %29 : vector<1x32x1xf32> to vector<32x1xf32>
      %31 = vector.shape_cast %28 : vector<32x1xf32> to vector<1x32x1xf32>
      tpu.vector_store %arg5[%c0_23, %c0_24, %c0_25], %31 {strides = array<i32>} : memref<1x32x1xf32, #tpu.memory_space<vmem>>, vector<1x32x1xf32>,
      %cst_26 = arith.constant 0.000000e+00 : f32
      %32 = vector.broadcast %cst_26 : f32 to vector<32x1xf32>
      %c0_27 = arith.constant 0 : index
      %c0_28 = arith.constant 0 : index
      %c0_29 = arith.constant 0 : index
      %33 = vector.load %arg6[%c0_27, %c0_28, %c0_29] : memref<1x32x1xf32, #tpu.memory_space<vmem>>, vector<1x32x1xf32>
      %34 = vector.shape_cast %33 : vector<1x32x1xf32> to vector<32x1xf32>
      %35 = vector.shape_cast %32 : vector<32x1xf32> to vector<1x32x1xf32>
      tpu.vector_store %arg6[%c0_27, %c0_28, %c0_29], %35 {strides = array<i32>} : memref<1x32x1xf32, #tpu.memory_space<vmem>>, vector<1x32x1xf32>,
    } else {
    }
    %c0 = arith.constant 0 : index
    %c0_1 = arith.constant 0 : index
    %3 = vector.load %arg3[%c0, %c0_1] : memref<32x16xbf16, #tpu.memory_space<vmem>>, vector<32x16xbf16>
    %c0_2 = arith.constant 0 : index
    %c0_3 = arith.constant 0 : index
    %c0_4 = arith.constant 0 : index
    %4 = vector.load %arg2[%c0_2, %c0_3, %c0_4] : memref<1x16x256xbf16, #tpu.memory_space<vmem>>, vector<1x16x256xbf16>
    %5 = vector.shape_cast %4 : vector<1x16x256xbf16> to vector<16x256xbf16>
    %cst = arith.constant dense<0.000000e+00> : vector<32x256xf32>
    %6 = tpu.matmul %3, %5, %cst {dimension_numbers = #tpu.dot_dimension_numbers<[1], [0], [0], [1], [0, 0, 1, 1], [], []>} : vector<32x16xbf16>, vector<16x256xbf16>, vector<32x256xf32> -> vector<32x256xf32>
    %7 = arith.truncf %6 : vector<32x256xf32> to vector<32x256xbf16>
    %c0_5 = arith.constant 0 : index
    %c0_6 = arith.constant 0 : index
    %c0_7 = arith.constant 0 : index
    %8 = vector.load %arg4[%c0_5, %c0_6, %c0_7] : memref<1x32x256xbf16, #tpu.memory_space<vmem>>, vector<1x32x256xbf16>
    %9 = vector.shape_cast %8 : vector<1x32x256xbf16> to vector<32x256xbf16>
    %10 = vector.shape_cast %7 : vector<32x256xbf16> to vector<1x32x256xbf16>
    tpu.vector_store %arg4[%c0_5, %c0_6, %c0_7], %10 {strides = array<i32>} : memref<1x32x256xbf16, #tpu.memory_space<vmem>>, vector<1x32x256xbf16>,
    %c0_8 = arith.constant 0 : index
    %c0_9 = arith.constant 0 : index
    %c0_10 = arith.constant 0 : index
    %11 = vector.load %arg5[%c0_8, %c0_9, %c0_10] : memref<1x32x1xf32, #tpu.memory_space<vmem>>, vector<1x32x1xf32>
    %12 = vector.shape_cast %11 : vector<1x32x1xf32> to vector<32x1xf32>
    %cst_11 = arith.constant dense<0.000000e+00> : vector<32xf32>
    %13 = vector.multi_reduction <add>, %6, %cst_11 [1] : vector<32x256xf32> to vector<32xf32>
    %14 = vector.shape_cast %13 : vector<32xf32> to vector<32x1xf32>
    %15 = arith.addf %12, %14 : vector<32x1xf32>
    %c0_12 = arith.constant 0 : index
    %c0_13 = arith.constant 0 : index
    %c0_14 = arith.constant 0 : index
    %16 = vector.load %arg5[%c0_12, %c0_13, %c0_14] : memref<1x32x1xf32, #tpu.memory_space<vmem>>, vector<1x32x1xf32>
    %17 = vector.shape_cast %16 : vector<1x32x1xf32> to vector<32x1xf32>
    %18 = vector.shape_cast %15 : vector<32x1xf32> to vector<1x32x1xf32>
    tpu.vector_store %arg5[%c0_12, %c0_13, %c0_14], %18 {strides = array<i32>} : memref<1x32x1xf32, #tpu.memory_space<vmem>>, vector<1x32x1xf32>,
    %c0_15 = arith.constant 0 : index
    %c0_16 = arith.constant 0 : index
    %c0_17 = arith.constant 0 : index
    %19 = vector.load %arg6[%c0_15, %c0_16, %c0_17] : memref<1x32x1xf32, #tpu.memory_space<vmem>>, vector<1x32x1xf32>
    %20 = vector.shape_cast %19 : vector<1x32x1xf32> to vector<32x1xf32>
    %21 = arith.mulf %6, %6 : vector<32x256xf32>
    %cst_18 = arith.constant dense<0.000000e+00> : vector<32xf32>
    %22 = vector.multi_reduction <add>, %21, %cst_18 [1] : vector<32x256xf32> to vector<32xf32>
    %23 = vector.shape_cast %22 : vector<32xf32> to vector<32x1xf32>
    %24 = arith.addf %20, %23 : vector<32x1xf32>
    %c0_19 = arith.constant 0 : index
    %c0_20 = arith.constant 0 : index
    %c0_21 = arith.constant 0 : index
    %25 = vector.load %arg6[%c0_19, %c0_20, %c0_21] : memref<1x32x1xf32, #tpu.memory_space<vmem>>, vector<1x32x1xf32>
    %26 = vector.shape_cast %25 : vector<1x32x1xf32> to vector<32x1xf32>
    %27 = vector.shape_cast %24 : vector<32x1xf32> to vector<1x32x1xf32>
    tpu.vector_store %arg6[%c0_19, %c0_20, %c0_21], %27 {strides = array<i32>} : memref<1x32x1xf32, #tpu.memory_space<vmem>>, vector<1x32x1xf32>,
    return
  }
  func.func @transform_0(%arg0: i32, %arg1: i32) -> (i32, i32, i32) {
    %c0_i32 = arith.constant 0 : i32
    %c0_i32_0 = arith.constant 0 : i32
    return %arg0, %c0_i32, %arg1 : i32, i32, i32
  }
  func.func @transform_1(%arg0: i32, %arg1: i32) -> (i32, i32) {
    %c0_i32 = arith.constant 0 : i32
    %c0_i32_0 = arith.constant 0 : i32
    %c0_i32_1 = arith.constant 0 : i32
    return %c0_i32, %c0_i32_0 : i32, i32
  }
  func.func @transform_2(%arg0: i32, %arg1: i32) -> (i32, i32, i32) {
    %c0_i32 = arith.constant 0 : i32
    %c0_i32_0 = arith.constant 0 : i32
    return %arg0, %c0_i32, %arg1 : i32, i32, i32
  }
  func.func @transform_3(%arg0: i32, %arg1: i32) -> (i32, i32, i32) {
    %c0_i32 = arith.constant 0 : i32
    %c0_i32_0 = arith.constant 0 : i32
    %c0_i32_1 = arith.constant 0 : i32
    return %arg0, %c0_i32, %c0_i32_0 : i32, i32, i32
  }
  func.func @transform_4(%arg0: i32, %arg1: i32) -> (i32, i32, i32) {
    %c0_i32 = arith.constant 0 : i32
    %c0_i32_0 = arith.constant 0 : i32
    %c0_i32_1 = arith.constant 0 : i32
    return %arg0, %c0_i32, %c0_i32_0 : i32, i32, i32
  }
}

module attributes {stable_mosaic.version = 11 : i64} {
  func.func @_bn_relu_kernel(%arg0: i32, %arg1: i32, %arg2: memref<1x32x256xbf16, #tpu.memory_space<vmem>>, %arg3: memref<32x1xf32, #tpu.memory_space<vmem>>, %arg4: memref<32x1xf32, #tpu.memory_space<vmem>>, %arg5: memref<1x32x256xbf16, #tpu.memory_space<vmem>>) attributes {dimension_semantics = [#tpu.dimension_semantics<parallel>, #tpu.dimension_semantics<parallel>], iteration_bounds = array<i64: 2, 1>, scalar_prefetch = 0 : i64, scratch_operands = 0 : i64, tpu.core_type = #tpu.core_type<tc>, window_params = [{transform_indices = @transform_0, window_bounds = array<i64: 1, 32, 256>}, {pipeline_mode = #tpu.pipeline_mode<synchronous>, transform_indices = @transform_1, window_bounds = array<i64: 32, 1>}, {pipeline_mode = #tpu.pipeline_mode<synchronous>, transform_indices = @transform_2, window_bounds = array<i64: 32, 1>}, {transform_indices = @transform_3, window_bounds = array<i64: 1, 32, 256>}]} {
    %c0 = arith.constant 0 : index
    %c0_0 = arith.constant 0 : index
    %c0_1 = arith.constant 0 : index
    %0 = vector.load %arg2[%c0, %c0_0, %c0_1] : memref<1x32x256xbf16, #tpu.memory_space<vmem>>, vector<1x32x256xbf16>
    %1 = vector.shape_cast %0 : vector<1x32x256xbf16> to vector<32x256xbf16>
    %2 = arith.extf %1 : vector<32x256xbf16> to vector<32x256xf32>
    %c0_2 = arith.constant 0 : index
    %c0_3 = arith.constant 0 : index
    %3 = vector.load %arg3[%c0_2, %c0_3] : memref<32x1xf32, #tpu.memory_space<vmem>>, vector<32x1xf32>
    %4 = vector.broadcast %3 : vector<32x1xf32> to vector<32x256xf32>
    %5 = arith.mulf %2, %4 : vector<32x256xf32>
    %c0_4 = arith.constant 0 : index
    %c0_5 = arith.constant 0 : index
    %6 = vector.load %arg4[%c0_4, %c0_5] : memref<32x1xf32, #tpu.memory_space<vmem>>, vector<32x1xf32>
    %7 = vector.broadcast %6 : vector<32x1xf32> to vector<32x256xf32>
    %8 = arith.addf %5, %7 : vector<32x256xf32>
    %cst = arith.constant 0.000000e+00 : f32
    %9 = vector.broadcast %cst : f32 to vector<32x256xf32>
    %10 = arith.maximumf %8, %9 : vector<32x256xf32>
    %11 = arith.truncf %10 : vector<32x256xf32> to vector<32x256xbf16>
    %c0_6 = arith.constant 0 : index
    %c0_7 = arith.constant 0 : index
    %c0_8 = arith.constant 0 : index
    %12 = vector.load %arg5[%c0_6, %c0_7, %c0_8] : memref<1x32x256xbf16, #tpu.memory_space<vmem>>, vector<1x32x256xbf16>
    %13 = vector.shape_cast %12 : vector<1x32x256xbf16> to vector<32x256xbf16>
    %14 = vector.shape_cast %11 : vector<32x256xbf16> to vector<1x32x256xbf16>
    tpu.vector_store %arg5[%c0_6, %c0_7, %c0_8], %14 {strides = array<i32>} : memref<1x32x256xbf16, #tpu.memory_space<vmem>>, vector<1x32x256xbf16>,
    return
  }
  func.func @transform_0(%arg0: i32, %arg1: i32) -> (i32, i32, i32) {
    %c0_i32 = arith.constant 0 : i32
    %c0_i32_0 = arith.constant 0 : i32
    return %arg0, %c0_i32, %arg1 : i32, i32, i32
  }
  func.func @transform_1(%arg0: i32, %arg1: i32) -> (i32, i32) {
    %c0_i32 = arith.constant 0 : i32
    %c0_i32_0 = arith.constant 0 : i32
    %c0_i32_1 = arith.constant 0 : i32
    return %c0_i32, %c0_i32_0 : i32, i32
  }
  func.func @transform_2(%arg0: i32, %arg1: i32) -> (i32, i32) {
    %c0_i32 = arith.constant 0 : i32
    %c0_i32_0 = arith.constant 0 : i32
    %c0_i32_1 = arith.constant 0 : i32
    return %c0_i32, %c0_i32_0 : i32, i32
  }
  func.func @transform_3(%arg0: i32, %arg1: i32) -> (i32, i32, i32) {
    %c0_i32 = arith.constant 0 : i32
    %c0_i32_0 = arith.constant 0 : i32
    return %arg0, %c0_i32, %arg1 : i32, i32, i32
  }
}

</mosaic_0001>

<bundles_post_ra>
// kernel: tile.18
= control target key start
LH: loop header
LB: loop body
LE: loop exit
PB: predicated region body
PF: predicated region fallthrough
CT: control target
= control target key end

     0   :  { %s22_s0 = inlined_call_operand.vmem [shape: f32[8], index: 0, kind: input, shape index: {}]   ;;  %s23_s1 = inlined_call_operand.vmem [shape: f32[4,8], index: 1, kind: output, shape index: {}]  }
   0x1   :  { %v4_v0 = vld [vmem:[%s22_s0] ss:$0 sm:$0xff] }
   0x2   :  { %5 = vst [vmem:[%s23_s1] sm:$0xf] %v4_v0 }

// kernel: tile.0
= control target key start
LH: loop header
LB: loop body
LE: loop exit
PB: predicated region body
PF: predicated region fallthrough
CT: control target
= control target key end

     0   :  { %s66_s8 = smov 125   ;;  %vm7_vm0 = vcmask 7168   ;;  %s67_s11 = smov 126   ;;  %s117_s0 = inlined_call_operand.vmem [shape: f32[4,8], index: 0, kind: input, shape index: {}]   ;;  %s118_s1 = inlined_call_operand.vmem [shape: f32[32,1], index: 1, kind: output, shape index: {}]  }
   0x1   :  { %v4_v0 = vld [vmem:[%s117_s0] sm:$0xf]  ;;  %s65_s0 = smov 127   ;;  %s68_s12 = smov 124  }
   0x2   :  { %5 = vst [vmem:[#allocation0] sm:$0xf] %v4_v0  ;;  %s69_s13 = smov 123   ;;  %s70_s14 = smov 122  }
   0x3   :  { %s71_s15 = smov 121  }
   0x9   :  { %v9_v1 = vld [vmem:[#allocation0] sm:$0xf]  }
   0xa   :  { %v21_v2 = vld [vmem:[#allocation0] sm:$0xf]   ;;  %10 = vrot.lane.b32.xlu0 %v9_v1, %s65_s0 }
   0xb   :  { %22 = vrot.lane.b32.xlu1 %v21_v2, %s66_s8  ;;  %v15_v3 = vld [vmem:[#allocation0] sm:$0xf]  }
   0xc   :  { %v27_v4 = vld [vmem:[#allocation0] sm:$0xf]  }
   0xd   :  { %v6_v5 = vld [vmem:[#allocation0] sm:$0xf]  }
   0xe   :  { %8 = vst.msk [vmem:[%s118_s1] ss:$8 sm:$0xf] %vm7_vm0, %v6_v5   ;;  %16 = vrot.lane.b32.xlu0 %v15_v3, %s67_s11  ;;  %v33_v6 = vld [vmem:[#allocation0] sm:$0xf]  }
   0xf   :  { %28 = vrot.lane.b32.xlu1 %v27_v4, %s68_s12  ;;  %v39_v7 = vld [vmem:[#allocation0] sm:$0xf]  }
  0x10   :  { %v45_v8 = vld [vmem:[#allocation0] sm:$0xf]  }
  0x12   :  { %34 = vrot.lane.b32.xlu0 %v33_v6, %s69_s13 }
  0x13   :  { %40 = vrot.lane.b32.xlu1 %v39_v7, %s70_s14 }
  0x16   :  { %46 = vrot.lane.b32.xlu0 %v45_v8, %s71_s15 }
  0x7c   :  { %v11_v9 = vpop.permute.xlu0 %10  }
  0x7d   :  { %v23_v10 = vpop.permute.xlu1 %22   ;;  %51 = vst.msk [vmem:[%s118_s1 + $0x1] ss:$8 sm:$0xf] %vm7_vm0, %v11_v9  }
  0x7e   :  { %53 = vst.msk [vmem:[%s118_s1 + $0x3] ss:$8 sm:$0xf] %vm7_vm0, %v23_v10  }
  0x80   :  { %v17_v11 = vpop.permute.xlu0 %16  }
  0x81   :  { %v29_v12 = vpop.permute.xlu1 %28   ;;  %52 = vst.msk [vmem:[%s118_s1 + $0x2] ss:$8 sm:$0xf] %vm7_vm0, %v17_v11  }
  0x82   :  { %54 = vst.msk [vmem:[%s118_s1 + $0x4] ss:$8 sm:$0xf] %vm7_vm0, %v29_v12  }
  0x84   :  { %v35_v13 = vpop.permute.xlu0 %34  }
  0x85   :  { %v41_v14 = vpop.permute.xlu1 %40   ;;  %55 = vst.msk [vmem:[%s118_s1 + $0x5] ss:$8 sm:$0xf] %vm7_vm0, %v35_v13  }
  0x86   :  { %56 = vst.msk [vmem:[%s118_s1 + $0x6] ss:$8 sm:$0xf] %vm7_vm0, %v41_v14  }
  0x88   :  { %v47_v15 = vpop.permute.xlu0 %46  }
  0x89   :  { %57 = vst.msk [vmem:[%s118_s1 + $0x7] ss:$8 sm:$0xf] %vm7_vm0, %v47_v15  }

// kernel: decbdr2d_forward.3
= control target key start
LH: loop header
LB: loop body
LE: loop exit
PB: predicated region body
PF: predicated region fallthrough
CT: control target
= control target key end

     0   :  { %s502_s12 = smov 0   ;;  %s504_s13 = smov 0   ;;  %s570_s0 = inlined_call_operand.vmem [shape: bf16[2,32,256], index: 0, kind: input, shape index: {}, may-alias: {0,3}]   ;;  %s571_s1 = inlined_call_operand.vmem [shape: f32[32,1], index: 1, kind: input, shape index: {}]   ;;  %s572_s2 = inlined_call_operand.vmem [shape: f32[32,1], index: 2, kind: input, shape index: {}]   ;;  %s573_s3 = inlined_call_operand.vmem [shape: bf16[2,32,256], index: 3, kind: output, shape index: {}, may-alias: {0,3}]  }
   0x1   :  { %s506_s14 = smov 0  }
   0x2 LB: > { %s25_s15 = sadd.s32 1, %s475_s13  ;;  %p413_p0 = scmp.ge.s32.totalorder %s479_s14, 1  ;;  %s479_s14 = sphi %s506_s14, %s13_s14   ;;  %s475_s13 = sphi %s504_s13, %s575_s13   ;;  %s471_s12 = sphi %s502_s12, %s574_s12  }
   0x3   : > { %p27_p1 = scmp.ge.s32.totalorder %s25_s15, 2  ;;  %p158_p2 = scmp.lt.s32.totalorder %s479_s14, 3 }
   0x5   : > { %s577_s15 = smov (%p27_p1, %s25_s15), 0  ;;  %p159_p3 = pnand %p413_p0, %p158_p2 }
   0x6   : > { %v224_v0 = vld [vmem:[%s571_s1 + $0x10] sm:$0xff] (!%p159_p3)  ;;  %v222_v1 = vld [vmem:[%s571_s1] sm:$0xff] (!%p159_p3)  ;;  %v481_v2 = vmov (!%p159_p3), 0   ;;  %v225_v3 = vld [vmem:[%s571_s1 + $0x18] sm:$0xff] (!%p159_p3)  ;;  %p191_p4 = scmp.lt.s32.totalorder (!%p159_p3), %s471_s12, 1 }
   0x7   : > { %162 = sbr.rel (%p159_p3) target bundleno = 156 (0x9c), region = 32  ;;  %456 = vset.pattern.permute.xlu1 (!%p159_p3), %v481_v2  ;;  %455 = vset.pattern.permute.xlu0 (!%p159_p3), %v481_v2  ;;  %v223_v4 = vld [vmem:[%s571_s1 + $0x8] sm:$0xff] (!%p159_p3)  ;;  %v254_v6 = vld [vmem:[%s572_s2] sm:$0xff] (!%p159_p3)  ;;  %v257_v7 = vld [vmem:[%s572_s2 + $0x18] sm:$0xff] (!%p159_p3) }
   0x8   : > { %238 = vperm.xlu1 (!%p159_p3), %456, %v224_v0   ;;  %228 = vperm.xlu0 (!%p159_p3), %455, %v222_v1   ;;  %v255_v5 = vld [vmem:[%s572_s2 + $0x8] sm:$0xff] (!%p159_p3)  ;;  %v256_v8 = vld [vmem:[%s572_s2 + $0x10] sm:$0xff] (!%p159_p3) }
   0xc   : > { %243 = vperm.xlu1 (!%p159_p3), %456, %v225_v3   ;;  %233 = vperm.xlu0 (!%p159_p3), %455, %v223_v4  }
   0xe   : > { %s579_s12 = smov (!%p191_p4, %s471_s12), 1 }
   0xf   : > { %s424_s5 = sshll.u32 %s579_s12, 5 }
  0x10   : > { %265 = vperm.xlu1 %456, %v255_v5   ;;  %260 = vperm.xlu0 %455, %v254_v6   ;;  %s198_s8 = scalar_lea.vmem %s570_s0, %s424_s5  ;;  %s208_s11 = scalar_lea.vmem %s573_s3, %s424_s5 }
  0x11   : > { %v210_v11 = vld [vmem:[%s198_s8] sm:$0xff]  ;;  %v211_v12 = vld [vmem:[%s198_s8 + $0x8] sm:$0xff]  ;;  %v213_v15 = vld [vmem:[%s198_s8 + $0x18] sm:$0xff] }
  0x12   : > { %v214_v13 = vunpack.c.l.bf16 %v210_v11  ;;  %v215_v14 = vunpack.c.h.bf16 %v210_v11  ;;  %v216_v16 = vunpack.c.l.bf16 %v211_v12  ;;  %v217_v17 = vunpack.c.h.bf16 %v211_v12  ;;  %v212_v20 = vld [vmem:[%s198_s8 + $0x10] sm:$0xff] }
  0x13   : > { %v220_v21 = vunpack.c.l.bf16 %v213_v15  ;;  %v221_v22 = vunpack.c.h.bf16 %v213_v15  ;;  %v218_v27 = vunpack.c.l.bf16 %v212_v20  ;;  %v219_v28 = vunpack.c.h.bf16 %v212_v20 }
  0x14   : > { %275 = vperm.xlu1 %456, %v257_v7   ;;  %270 = vperm.xlu0 %455, %v256_v8  }
  0x87   : > { %v239_v9 = vpop.permute.xlu1 %238  ;;  %v229_v10 = vpop.permute.xlu0 %228 }
  0x88   : > { %v246_v23 = vmul.f32 %v229_v10, %v214_v13  ;;  %v247_v24 = vmul.f32 %v229_v10, %v215_v14  ;;  %v250_v41 = vmul.f32 %v239_v9, %v218_v27  ;;  %v251_v42 = vmul.f32 %v239_v9, %v219_v28 }
  0x8b   : > { %v244_v18 = vpop.permute.xlu1 %243  ;;  %v234_v19 = vpop.permute.xlu0 %233 }
  0x8c   : > { %v248_v25 = vmul.f32 %v234_v19, %v216_v16  ;;  %v249_v26 = vmul.f32 %v234_v19, %v217_v17  ;;  %v252_v35 = vmul.f32 %v244_v18, %v220_v21  ;;  %v253_v36 = vmul.f32 %v244_v18, %v221_v22 }
  0x8f   : > { %v266_v29 = vpop.permute.xlu1 %265  ;;  %v261_v30 = vpop.permute.xlu0 %260 }
  0x90   : > { %v280_v31 = vadd.f32 %v266_v29, %v248_v25  ;;  %v281_v32 = vadd.f32 %v266_v29, %v249_v26  ;;  %v278_v33 = vadd.f32 %v261_v30, %v246_v23  ;;  %v279_v34 = vadd.f32 %v261_v30, %v247_v24 }
  0x92   : > { %v288_v37 = vmax.f32 %v280_v31, 0.0  ;;  %v289_v38 = vmax.f32 %v281_v32, 0.0  ;;  %v286_v39 = vmax.f32 %v278_v33, 0.0  ;;  %v287_v40 = vmax.f32 %v279_v34, 0.0 }
  0x93   : > { %v276_v43 = vpop.permute.xlu1 %275  ;;  %v271_v44 = vpop.permute.xlu0 %270 }
  0x94   : > { %v427_v45 = vpack.c.bf16 %v289_v38, %v288_v37  ;;  %v426_v46 = vpack.c.bf16 %v287_v40, %v286_v39  ;;  %v284_v47 = vadd.f32 %v276_v43, %v252_v35  ;;  %v285_v48 = vadd.f32 %v276_v43, %v253_v36 }
  0x95   : > { %v282_v49 = vadd.f32 %v271_v44, %v250_v41  ;;  %v283_v50 = vadd.f32 %v271_v44, %v251_v42 }
  0x96   : > { %319 = vst [vmem:[%s208_s11 + $0x8] sm:$0xff] %v427_v45  ;;  %318 = vst [vmem:[%s208_s11] sm:$0xff] %v426_v46  ;;  %v292_v51 = vmax.f32 %v284_v47, 0.0  ;;  %v293_v52 = vmax.f32 %v285_v48, 0.0 }
  0x97   : > { %v290_v53 = vmax.f32 %v282_v49, 0.0  ;;  %v291_v54 = vmax.f32 %v283_v50, 0.0 }
  0x98   : > { %v429_v55 = vpack.c.bf16 %v293_v52, %v292_v51 }
  0x99   : > { %v428_v56 = vpack.c.bf16 %v291_v54, %v290_v53 }
  0x9a   : > { %321 = vst [vmem:[%s208_s11 + $0x18] sm:$0xff] %v429_v55 }
  0x9b   : > { %320 = vst [vmem:[%s208_s11 + $0x10] sm:$0xff] %v428_v56 }
  0x9c PF: > { %s13_s14 = sadd.s32 1, %s479_s14   ;;  %s574_s12 = smov %s475_s13 }
  0x9d   : > { %p10_p5 = scmp.ge.s32.totalorder %s13_s14, 4   ;;  %s575_s13 = smov %s577_s15 }
  0x9f   :  { %12 = sbr.rel (!%p10_p5) target bundleno = 2 (0x2), region = 62 }

// kernel: decbdr2d_forward.2
= control target key start
LH: loop header
LB: loop body
LE: loop exit
PB: predicated region body
PF: predicated region fallthrough
CT: control target
= control target key end

     0   :  { %s717_s15 = smov 0   ;;  %s719_s16 = smov 0   ;;  %s806_s0 = inlined_call_operand.vmem [shape: bf16[2,16,256], index: 0, kind: input, shape index: {}]   ;;  %s807_s1 = inlined_call_operand.vmem [shape: bf16[32,16], index: 1, kind: input, shape index: {}]   ;;  %s808_s2 = inlined_call_operand.vmem [shape: bf16[2,32,256], index: 2, kind: output, shape index: {0}]   ;;  %s809_s3 = inlined_call_operand.vmem [shape: f32[2,32,1], index: 3, kind: output, shape index: {1}]   ;;  %s810_s4 = inlined_call_operand.vmem [shape: f32[2,32,1], index: 4, kind: output, shape index: {2}]  }
   0x1   :  { %s721_s17 = smov 0  }
   0x2 LB: > { %s27_s18 = sadd.s32 1, %s684_s16  ;;  %p604_p0 = scmp.ge.s32.totalorder %s688_s17, 1  ;;  %s688_s17 = sphi %s721_s17, %s15_s17   ;;  %s684_s16 = sphi %s719_s16, %s812_s16   ;;  %s680_s15 = sphi %s717_s15, %s811_s15  }
   0x3   : > { %p29_p1 = scmp.ge.s32.totalorder %s27_s18, 2  ;;  %p188_p2 = scmp.lt.s32.totalorder %s688_s17, 3 }
   0x5   : > { %s814_s18 = smov (%p29_p1, %s27_s18), 0  ;;  %p189_p3 = pnand %p604_p0, %p188_p2 }
   0x6   : > { %p233_p4 = scmp.lt.s32.totalorder (!%p189_p3), %s680_s15, 1  ;;  %v690_v0 = vmov (!%p189_p3), 0   ;;  %v664_v3 = vld [vmem:[%s807_s1] sm:$0xff] (!%p189_p3)   ;;  %v665_v4 = vld [vmem:[%s807_s1 + $0x8] sm:$0xff] (!%p189_p3)   ;;  %vm302_vm0 = vcmask (!%p189_p3), 130048   ;;  %vm267_vm1 = vcmask (!%p189_p3), 7168  }
   0x7   : > { %192 = sbr.rel (%p189_p3) target bundleno = 395 (0x18b), region = 28  ;;  %341 = vmatprep.mubr.bf16.mxu0 (!%p189_p3), %v690_v0  ;;  %351 = vmatprep.mubr.bf16.mxu1 (!%p189_p3), %v690_v0  ;;  %v691_v5 = vmov (!%p189_p3), 0.0  }
   0xe   : > { %s816_s15 = smov (!%p233_p4, %s680_s15), 1 }
   0xf   : > { %s625_s19 = sshll.u32 %s816_s15, 4  ;;  %s626_s27 = sshll.u32 %s816_s15, 5 }
  0x10   : > { %s240_s22 = scalar_lea.vmem %s806_s0, %s625_s19  ;;  %s747_s30 = scalar_lea.vmem %s809_s3, %s626_s27 }
  0x11   : > { %v661_v1 = vld [vmem:[%s240_s22 + $0x4] ss:$8 sps:$4 sm:$0xff]   ;;  %v663_v2 = vld [vmem:[%s240_s22] ss:$8 sps:$4 sm:$0xff]   ;;  %s752_s7 = scalar_lea.vmem %s810_s4, %s626_s27  ;;  %270 = vst.msk [vmem:[%s747_s30 + $0x10] sm:$0xff] %vm267_vm1, %v691_v5  ;;  %268 = vst.msk [vmem:[%s747_s30] sm:$0xff] %vm267_vm1, %v691_v5  ;;  %s250_s10 = scalar_lea.vmem %s808_s2, %s626_s27 }
  0x12   : > { %309 = vmatprep.subr.bf16.mxu0 %v661_v1  ;;  %633 = vmatprep.subr.bf16.mxu1 %v661_v1  ;;  %269 = vst.msk [vmem:[%s747_s30 + $0x8] sm:$0xff] %vm267_vm1, %v691_v5  ;;  %271 = vst.msk [vmem:[%s747_s30 + $0x18] sm:$0xff] %vm267_vm1, %v691_v5 }
  0x13   : > { %310 = vmatpush1.bf16.msra.mxu0 %v663_v2  ;;  %634 = vmatpush1.bf16.msra.mxu1 %v663_v2  ;;  %272 = vst.msk [vmem:[%s752_s7] sm:$0xff] %vm267_vm1, %v691_v5  ;;  %273 = vst.msk [vmem:[%s752_s7 + $0x8] sm:$0xff] %vm267_vm1, %v691_v5 }
  0x14   : > { %274 = vst.msk [vmem:[%s752_s7 + $0x10] sm:$0xff] %vm267_vm1, %v691_v5  ;;  %275 = vst.msk [vmem:[%s752_s7 + $0x18] sm:$0xff] %vm267_vm1, %v691_v5 }
  0x16   : > { %617 = vmatmul.mubr.msk.bf16.vlgmr.msra.gmra.mrb[0].mxu0 %vm302_vm0, %v664_v3  ;;  %618 = vmatmul.mubr.msk.bf16.vlgmr.msra.gmra.mrb[0].mxu1 %vm302_vm0, %v665_v4 }
  0x18   : > { %v392_v34 = vld [vmem:[%s747_s30 + $0x10] sm:$0xff]  ;;  %v390_v35 = vld [vmem:[%s747_s30] sm:$0xff] }
  0x19   : > { %v393_v40 = vld [vmem:[%s747_s30 + $0x18] sm:$0xff]  ;;  %v391_v41 = vld [vmem:[%s747_s30 + $0x8] sm:$0xff] }
  0x1a   : > { %v416_v46 = vld [vmem:[%s752_s7 + $0x8] sm:$0xff]  ;;  %v415_v47 = vld [vmem:[%s752_s7] sm:$0xff] }
  0x1b   : > { %v418_v52 = vld [vmem:[%s752_s7 + $0x18] sm:$0xff]  ;;  %v417_v53 = vld [vmem:[%s752_s7 + $0x10] sm:$0xff] }
  0xe9   : > { %v343_v6 = vpop.f32.mrb[0].mxu0  ;;  %v353_v7 = vpop.f32.mrb[0].mxu1 }
  0xea   : > { %v345_v8 = vpop.f32.mrb[1].mxu0  ;;  %v355_v9 = vpop.f32.mrb[1].mxu1  ;;  %v419_v10 = vmul.f32 %v343_v6, %v343_v6  ;;  %v423_v11 = vmul.f32 %v353_v7, %v353_v7 }
  0xeb   : > { %v629_v12 = vpack.c.bf16 %v345_v8, %v343_v6  ;;  %v631_v13 = vpack.c.bf16 %v355_v9, %v353_v7  ;;  %v347_v14 = vpop.f32.mrb[2].mxu0  ;;  %v357_v15 = vpop.f32.mrb[2].mxu1  ;;  %v400_v16 = vadd.f32 %v355_v9, %v353_v7  ;;  %v394_v17 = vadd.f32 %v345_v8, %v343_v6 }
  0xec   : > { %v349_v18 = vpop.f32.mrb[3].mxu0  ;;  %v359_v19 = vpop.f32.mrb[3].mxu1  ;;  %v421_v20 = vmul.f32 %v347_v14, %v347_v14  ;;  %v420_v21 = vmul.f32 %v345_v8, %v345_v8  ;;  %v425_v22 = vmul.f32 %v357_v15, %v357_v15  ;;  %v424_v23 = vmul.f32 %v355_v9, %v355_v9 }
  0xed   : > { %386 = vst [vmem:[%s250_s10] sm:$0xff] %v629_v12  ;;  %388 = vst [vmem:[%s250_s10 + $0x10] sm:$0xff] %v631_v13  ;;  %v630_v24 = vpack.c.bf16 %v349_v18, %v347_v14  ;;  %v422_v25 = vmul.f32 %v349_v18, %v349_v18  ;;  %v632_v26 = vpack.c.bf16 %v359_v19, %v357_v15  ;;  %401 = vadd.xlane.f32.xlu1 %v400_v16 }
  0xee   : > { %v426_v27 = vmul.f32 %v359_v19, %v359_v19  ;;  %395 = vadd.xlane.f32.xlu0 %v394_v17  ;;  %v403_v28 = vadd.f32 %v359_v19, %v357_v15  ;;  %v397_v29 = vadd.f32 %v349_v18, %v347_v14  ;;  %v427_v30 = vadd.f32 %v420_v21, %v419_v10 }
  0xef   : > { %v433_v31 = vadd.f32 %v424_v23, %v423_v11  ;;  %387 = vst [vmem:[%s250_s10 + $0x8] sm:$0xff] %v630_v24  ;;  %389 = vst [vmem:[%s250_s10 + $0x18] sm:$0xff] %v632_v26  ;;  %v430_v32 = vadd.f32 %v422_v25, %v421_v20 }
  0xf0   : > { %v436_v33 = vadd.f32 %v426_v27, %v425_v22 }
  0xf1   : > { %404 = vadd.xlane.f32.xlu1 %v403_v28 }
  0xf2   : > { %398 = vadd.xlane.f32.xlu0 %v397_v29 }
  0xf5   : > { %431 = vadd.xlane.f32.xlu1 %v430_v32 }
  0xf6   : > { %428 = vadd.xlane.f32.xlu0 %v427_v30 }
  0xf9   : > { %437 = vadd.xlane.f32.xlu1 %v436_v33 }
  0xfa   : > { %434 = vadd.xlane.f32.xlu0 %v433_v31 }
 0x17a   : > { %v402_v36 = vpop.xlane.xlu1 %401 }
 0x17b   : > { %v408_v37 = vadd.f32 %v402_v36, %v392_v34  ;;  %v396_v38 = vpop.xlane.xlu0 %395 }
 0x17c   : > { %v406_v39 = vadd.f32 %v396_v38, %v390_v35 }
 0x17d   : > { %413 = vst.msk [vmem:[%s747_s30 + $0x10] sm:$0xff] %vm267_vm1, %v408_v37 }
 0x17e   : > { %411 = vst.msk [vmem:[%s747_s30] sm:$0xff] %vm267_vm1, %v406_v39  ;;  %v405_v42 = vpop.xlane.xlu1 %404 }
 0x17f   : > { %v409_v43 = vadd.f32 %v405_v42, %v393_v40  ;;  %v399_v44 = vpop.xlane.xlu0 %398 }
 0x180   : > { %v407_v45 = vadd.f32 %v399_v44, %v391_v41 }
 0x181   : > { %414 = vst.msk [vmem:[%s747_s30 + $0x18] sm:$0xff] %vm267_vm1, %v409_v43 }
 0x182   : > { %412 = vst.msk [vmem:[%s747_s30 + $0x8] sm:$0xff] %vm267_vm1, %v407_v45  ;;  %v432_v48 = vpop.xlane.xlu1 %431 }
 0x183   : > { %v440_v49 = vadd.f32 %v432_v48, %v416_v46  ;;  %v429_v50 = vpop.xlane.xlu0 %428 }
 0x184   : > { %v439_v51 = vadd.f32 %v429_v50, %v415_v47 }
 0x185   : > { %444 = vst.msk [vmem:[%s752_s7 + $0x8] sm:$0xff] %vm267_vm1, %v440_v49 }
 0x186   : > { %443 = vst.msk [vmem:[%s752_s7] sm:$0xff] %vm267_vm1, %v439_v51  ;;  %v438_v54 = vpop.xlane.xlu1 %437 }
 0x187   : > { %v442_v55 = vadd.f32 %v438_v54, %v418_v52  ;;  %v435_v56 = vpop.xlane.xlu0 %434 }
 0x188   : > { %v441_v57 = vadd.f32 %v435_v56, %v417_v53 }
 0x189   : > { %446 = vst.msk [vmem:[%s752_s7 + $0x18] sm:$0xff] %vm267_vm1, %v442_v55 }
 0x18a   : > { %445 = vst.msk [vmem:[%s752_s7 + $0x10] sm:$0xff] %vm267_vm1, %v441_v57 }
 0x18b PF: > { %s15_s17 = sadd.s32 1, %s688_s17   ;;  %s811_s15 = smov %s684_s16 }
 0x18c   : > { %p12_p5 = scmp.ge.s32.totalorder %s15_s17, 4   ;;  %s812_s16 = smov %s814_s18 }
 0x18e   :  { %14 = sbr.rel (!%p12_p5) target bundleno = 2 (0x2), region = 86 }

</bundles_post_ra>
